<compile_context>
chip_gen: v7x
topology: tpu7x:2x2x1
jax: 0.10.0
libtpu: 0.0.40
codegen_flags: <defaults>
</compile_context>

<pallas_src>
import functools

import jax
import jax.numpy as jnp
from jax.experimental import pallas as pl
from jax.experimental.pallas import tpu as pltpu


def _ohem_ce_kernel(ignore_lb, logits_ref, labels_ref, loss_ref):
    """Per-pixel cross-entropy with ignore_index, reduction='none'.

    logits_ref: (1, C, TP)  -- classes on sublanes, pixels on lanes
    labels_ref: (1, 1, TP)  int32
    loss_ref:   (1, 1, TP)  float32
    """
    x = logits_ref[0].astype(jnp.float32)                 # (C, TP), f32 math
    lbl = labels_ref[0]                                    # (1, TP) int32

    # numerically-stable log-sum-exp over the class (sublane) axis
    m = jnp.max(x, axis=0, keepdims=True)                  # (1, TP)
    lse = jnp.log(jnp.sum(jnp.exp(x - m), axis=0, keepdims=True)) + m

    valid = lbl != ignore_lb                               # (1, TP) bool
    safe_lbl = jnp.where(valid, lbl, 0)                    # clamp ignored labels
    row = jax.lax.broadcasted_iota(jnp.int32, x.shape, 0)  # class index per row
    picked = jnp.sum(jnp.where(row == safe_lbl, x, 0.0), axis=0, keepdims=True)

    loss = lse - picked                                    # -log_softmax(x)[label]
    # PyTorch CrossEntropyLoss(reduction='none') yields 0 for ignored pixels
    loss_ref[0] = jnp.where(valid, loss, 0.0)


def _choose_tile(hw, n, c, itemsize, *, max_tile=65536,
                 vmem_budget=24 << 20, min_grid_steps=8):
    """Largest 128-aligned pixel tile that fits the VMEM budget.

    Budget accounts for the double-buffered logits block (C padded to the
    sublane packing of its dtype) plus the label / loss blocks (sublane dim
    padded to 8).  Tile is additionally capped so the grid keeps enough steps
    to shard across v7x's two TensorCores.
    """
    sub = max(1, 32 // itemsize)                  # sublane packing (8 f32, 16 bf16)
    c_pad = -(-c // sub) * sub
    bytes_per_pixel = 2 * (c_pad * itemsize + 8 * 4 + 8 * 4)
    tile = vmem_budget // bytes_per_pixel
    tile = min(tile, max_tile, max(hw, 128))
    tile = max(128, (tile // 128) * 128)
    # keep >= ~8 grid steps so v7x's 2 TCs both get work (v5e/v6e: harmless)
    while tile > 128 and n * pl.cdiv(hw, tile) < min_grid_steps:
        tile = max(128, ((tile // 2) // 128) * 128)
    return int(tile)


def pixelwise_ce(logits_nchw, labels, ignore_lb=255):
    """Per-pixel CE loss, shape (N*H*W,), via a Pallas kernel.

    Keeps NCHW layout (no HBM transpose), feeds logits in their native dtype
    (upcast to f32 inside the kernel), and uses large lane-dense pixel tiles.
    Ragged last tiles are handled by Pallas (padded reads, discarded writes).
    """
    N, C, H, W = logits_nchw.shape
    HW = H * W
    tile = _choose_tile(HW, N, C, logits_nchw.dtype.itemsize)
    n_tiles = pl.cdiv(HW, tile)

    x = logits_nchw.reshape(N, C, HW)                    # free reshape, native dtype
    y = labels.reshape(N, 1, HW)
    if y.dtype != jnp.int32:
        y = y.astype(jnp.int32)

    kernel = functools.partial(_ohem_ce_kernel, ignore_lb)
    out = pl.pallas_call(
        kernel,
        out_shape=jax.ShapeDtypeStruct((N, 1, HW), jnp.float32),
        grid_spec=pltpu.PrefetchScalarGridSpec(
            num_scalar_prefetch=0,
            grid=(N, n_tiles),
            in_specs=[
                pl.BlockSpec((1, C, tile), lambda n, p: (n, 0, p)),
                pl.BlockSpec((1, 1, tile), lambda n, p: (n, 0, p)),
            ],
            out_specs=pl.BlockSpec((1, 1, tile), lambda n, p: (n, 0, p)),
        ),
        compiler_params=pltpu.CompilerParams(
            dimension_semantics=("parallel", "parallel"),
            vmem_limit_bytes=48 << 20,
        ),
    )(x, y)
    return out.reshape(-1)


def ohem_ce_loss(logits, labels, thresh=0.7, n_min=0.1, ignore_lb=255):
    """Forward pass of OhemCELoss (n_min is a fraction of P, as in the spec)."""
    loss = pixelwise_ce(logits, labels, ignore_lb)          # (P,)
    P = loss.shape[0]
    k = int(n_min * P)
    k = max(1, min(k, P - 1))                               # guard k==0 / k==P (tiny deviation at extremes)
    thresh_val = jnp.asarray(-jnp.log(jnp.float32(thresh)), jnp.float32)

    # OHEM selection without a full O(P log P) sort in the hot path:
    #   loss_sorted[k] > thresh  <=>  count(loss > thresh) > k   (exact)
    gt = loss > thresh_val
    count = jnp.sum(gt.astype(jnp.float32))
    hard_sum = jnp.sum(jnp.where(gt, loss, 0.0))
    cond = count > k

    def _mean_above_thresh(_):
        # count > k >= 1 on this branch, so no div-by-zero
        return hard_sum / count

    def _mean_topk(x):
        # cold fallback branch: exact top-k mean, only executed when needed
        vals, _ = jax.lax.top_k(x, k)
        return jnp.mean(vals)

    return jax.lax.cond(cond, _mean_above_thresh, _mean_topk, loss)


if __name__ == "__main__":
    key = jax.random.PRNGKey(0)
    k_logits, k_labels, k_ign = jax.random.split(key, 3)

    N, C, H, W = 2, 4, 16, 16
    logits = jax.random.normal(k_logits, (N, C, H, W), dtype=jnp.float32)
    labels = jax.random.randint(k_labels, (N, H, W), 0, C, dtype=jnp.int32)
    # sprinkle some ignore pixels (ignore_lb = 255)
    ignore_mask = jax.random.uniform(k_ign, (N, H, W)) < 0.05
    labels = jnp.where(ignore_mask, 255, labels)

    result = ohem_ce_loss(logits, labels, thresh=0.7, n_min=0.1, ignore_lb=255)
    jax.block_until_ready(result)

    # sanity: finite scalar
    assert result.shape == ()
    assert bool(jnp.isfinite(result))
    print("KERNEL_OK")
</pallas_src>

<mosaic_0001>
module attributes {stable_mosaic.version = 11 : i64} {
  func.func @_ohem_ce_kernel(%arg0: i32, %arg1: i32, %arg2: memref<1x4x128xf32, #tpu.memory_space<vmem>>, %arg3: memref<1x1x128xi32, #tpu.memory_space<vmem>>, %arg4: memref<1x1x128xf32, #tpu.memory_space<vmem>>) attributes {dimension_semantics = [#tpu.dimension_semantics<parallel>, #tpu.dimension_semantics<parallel>], iteration_bounds = array<i64: 2, 2>, scalar_prefetch = 0 : i64, scratch_operands = 0 : i64, tpu.core_type = #tpu.core_type<tc>, window_params = [{transform_indices = @transform_0, window_bounds = array<i64: 1, 4, 128>}, {transform_indices = @transform_1, window_bounds = array<i64: 1, 1, 128>}, {transform_indices = @transform_2, window_bounds = array<i64: 1, 1, 128>}]} {
    %c0 = arith.constant 0 : index
    %c0_0 = arith.constant 0 : index
    %c0_1 = arith.constant 0 : index
    %0 = vector.load %arg2[%c0, %c0_0, %c0_1] : memref<1x4x128xf32, #tpu.memory_space<vmem>>, vector<1x4x128xf32>
    %1 = vector.shape_cast %0 : vector<1x4x128xf32> to vector<4x128xf32>
    %c0_2 = arith.constant 0 : index
    %c0_3 = arith.constant 0 : index
    %c0_4 = arith.constant 0 : index
    %2 = vector.load %arg3[%c0_2, %c0_3, %c0_4] : memref<1x1x128xi32, #tpu.memory_space<vmem>>, vector<1x1x128xi32>
    %3 = vector.shape_cast %2 : vector<1x1x128xi32> to vector<1x128xi32>
    %cst = arith.constant dense<0xFF800000> : vector<128xf32>
    %4 = vector.multi_reduction <maximumf>, %1, %cst [0] : vector<4x128xf32> to vector<128xf32>
    %5 = vector.shape_cast %4 : vector<128xf32> to vector<1x128xf32>
    %6 = vector.broadcast %5 : vector<1x128xf32> to vector<4x128xf32>
    %7 = arith.subf %1, %6 : vector<4x128xf32>
    %8 = math.exp %7 : vector<4x128xf32>
    %cst_5 = arith.constant dense<0.000000e+00> : vector<128xf32>
    %9 = vector.multi_reduction <add>, %8, %cst_5 [0] : vector<4x128xf32> to vector<128xf32>
    %10 = vector.shape_cast %9 : vector<128xf32> to vector<1x128xf32>
    %11 = math.log %10 : vector<1x128xf32>
    %12 = arith.addf %11, %5 : vector<1x128xf32>
    %c255_i32 = arith.constant 255 : i32
    %13 = vector.broadcast %c255_i32 : i32 to vector<1x128xi32>
    %14 = arith.cmpi ne, %3, %13 : vector<1x128xi32>
    %c0_i32 = arith.constant 0 : i32
    %15 = vector.broadcast %c0_i32 : i32 to vector<1x128xi32>
    %16 = arith.select %14, %3, %15 : vector<1x128xi1>, vector<1x128xi32>
    %17 = tpu.iota {dimensions = array<i32: 0>} : vector<4x128xi32>
    %18 = vector.broadcast %16 : vector<1x128xi32> to vector<4x128xi32>
    %19 = arith.cmpi eq, %17, %18 : vector<4x128xi32>
    %cst_6 = arith.constant 0.000000e+00 : f32
    %20 = vector.broadcast %cst_6 : f32 to vector<4x128xf32>
    %21 = arith.select %19, %1, %20 : vector<4x128xi1>, vector<4x128xf32>
    %cst_7 = arith.constant dense<0.000000e+00> : vector<128xf32>
    %22 = vector.multi_reduction <add>, %21, %cst_7 [0] : vector<4x128xf32> to vector<128xf32>
    %23 = vector.shape_cast %22 : vector<128xf32> to vector<1x128xf32>
    %24 = arith.subf %12, %23 : vector<1x128xf32>
    %cst_8 = arith.constant 0.000000e+00 : f32
    %25 = vector.broadcast %cst_8 : f32 to vector<1x128xf32>
    %26 = arith.select %14, %24, %25 : vector<1x128xi1>, vector<1x128xf32>
    %c0_9 = arith.constant 0 : index
    %c0_10 = arith.constant 0 : index
    %c0_11 = arith.constant 0 : index
    %27 = vector.load %arg4[%c0_9, %c0_10, %c0_11] : memref<1x1x128xf32, #tpu.memory_space<vmem>>, vector<1x1x128xf32>
    %28 = vector.shape_cast %27 : vector<1x1x128xf32> to vector<1x128xf32>
    %29 = vector.shape_cast %26 : vector<1x128xf32> to vector<1x1x128xf32>
    tpu.vector_store %arg4[%c0_9, %c0_10, %c0_11], %29 {strides = array<i32>} : memref<1x1x128xf32, #tpu.memory_space<vmem>>, vector<1x1x128xf32>,
    return
  }
  func.func @transform_0(%arg0: i32, %arg1: i32) -> (i32, i32, i32) {
    %c0_i32 = arith.constant 0 : i32
    %c0_i32_0 = arith.constant 0 : i32
    return %arg0, %c0_i32, %arg1 : i32, i32, i32
  }
  func.func @transform_1(%arg0: i32, %arg1: i32) -> (i32, i32, i32) {
    %c0_i32 = arith.constant 0 : i32
    %c0_i32_0 = arith.constant 0 : i32
    return %arg0, %c0_i32, %arg1 : i32, i32, i32
  }
  func.func @transform_2(%arg0: i32, %arg1: i32) -> (i32, i32, i32) {
    %c0_i32 = arith.constant 0 : i32
    %c0_i32_0 = arith.constant 0 : i32
    return %arg0, %c0_i32, %arg1 : i32, i32, i32
  }
}

</mosaic_0001>

<bundles_post_ra>
// kernel: tpu_custom_call.1
= control target key start
LH: loop header
LB: loop body
LE: loop exit
PB: predicated region body
PF: predicated region fallthrough
CT: control target
= control target key end

     0   :  { %7 = vsyncpa [#allocation3], 0  ;;  %s905_s0 = inlined_call_operand.hbm [shape: f32[2,4,256], index: 0, kind: input, shape index: {}]   ;;  %s906_s1 = inlined_call_operand.hbm [shape: s32[2,1,256], index: 1, kind: input, shape index: {}]   ;;  %s907_s2 = inlined_call_operand.hbm [shape: f32[2,1,256], index: 2, kind: output, shape index: {}]  }
   0x1   :  { %9 = vsyncpa [#allocation3 + $0x1], 0 }
   0x2   :  { %10 = vsyncpa [#allocation6], 0 }
   0x3   :  { %12 = vsyncpa [#allocation6 + $0x1], 0 }
   0x4   :  { %13 = vsyncpa [#allocation4], 0 }
   0x5   :  { %15 = vsyncpa [#allocation4 + $0x1], 0  ;;  %s659_s9 = smov 0   ;;  %s661_s10 = smov 0  }
   0x6   :  { %s663_s11 = smov 0   ;;  %s665_s12 = smov 0  }
   0x7   :  { %s667_s13 = smov 0   ;;  %s669_s14 = smov 0  }
   0x8   :  { %s671_s15 = smov 0   ;;  %s673_s16 = smov 0  }
   0x9 LB: > { %s375_s17 = sadd.s32 4294967295, %s639_s16   ;;  %s376_s18 = sadd.s32 4294967294, %s639_s16   ;;  %s639_s16 = sphi %s673_s16, %s21_s16   ;;  %s635_s15 = sphi %s671_s15, %s928_s15   ;;  %s631_s14 = sphi %s669_s14, %s927_s14   ;;  %s627_s13 = sphi %s667_s13, %s926_s13   ;;  %s623_s12 = sphi %s665_s12, %s925_s12   ;;  %s619_s11 = sphi %s663_s11, %s924_s11   ;;  %s615_s10 = sphi %s661_s10, %s923_s10   ;;  %s611_s9 = sphi %s659_s9, %s922_s9  }
   0xa   : > { %s30_s19 = sadd.s32 1, %s631_s14  ;;  %s33_s20 = sadd.s32 1, %s635_s15 }
   0xb   : > { %p31_p0 = scmp.ge.s32.totalorder %s30_s19, 2  ;;  %s42_s21 = sadd.s32 1, %s619_s11 }
   0xc   : > { %p49_p1 = scmp.ne.s32.totalorder %s619_s11, %s615_s10  ;;  %p50_p2 = scmp.eq.s32.totalorder %s639_s16, 0 }
   0xd   : > { %s930_s19 = smov (%p31_p0, %s30_s19), 0  ;;  %s932_s20 = smov (!%p31_p0, %s33_s20), %s635_s15 }
   0xe   : > { %s38_s22 = ssub.s32 %s631_s14, %s930_s19  ;;  %p712_p3 = por %p50_p2, %p49_p1 }
   0xf   : > { %p35_p4 = scmp.ge.s32.totalorder %s932_s20, 2  ;;  %p55_p5 = scmp.ne.s32.totalorder %s615_s10, %s611_s9 }
  0x10   : > { %p56_p6 = scmp.eq.s32.totalorder %s375_s17, 0  ;;  %p109_p7 = scmp.eq.s32.totalorder %s375_s17, 3 }
  0x11   : > { %s934_s20 = smov (%p35_p4, %s932_s20), 0  ;;  %p115_p10 = scmp.eq.s32.totalorder %s376_s18, 3 }
  0x12   : > { %p720_p8 = por %p56_p6, %p55_p5  ;;  %p724_p9 = por %p109_p7, %p49_p1 }
  0x13   : > { %s37_s26 = ssub.s32 %s635_s15, %s934_s20  ;;  %p730_p12 = por %p115_p10, %p55_p5 }
  0x14   : > { %s911_s24 = scalar_select %p720_p8, 1, 0 }
  0x15   : > { %s912_s25 = scalar_select %p724_p9, 1, 0 }
  0x16   : > { %s39_s27 = sor.u32 %s38_s22, %s37_s26  ;;  %p407_p13 = scmp.lt.s32.totalorder %s639_s16, 4 }
  0x17   : > { %p40_p11 = scmp.eq.s32.totalorder %s39_s27, 0  ;;  %s736_s29 = sand.u32 1, %s619_s11  }
  0x18   : > { %s913_s28 = scalar_select %p730_p12, 1, 0 }
  0x19   : > { %s739_s30 = scalar_select %p40_p11, %s619_s11, %s42_s21  }
  0x1a   : > { %s379_s3 = sshll.u32 %s736_s29, 2  ;;  %s380_s4 = sshll.u32 %s635_s15, 1 }
  0x1b   : > { %s744_s5 = sadd.s32 %s631_s14, %s380_s4  ;;  %s139_s6 = scalar_lea.vmem [#allocation2], %s379_s3 }
  0x1c   : > { %s148_s7 = sshll.u32 %s139_s6, 4  ;;  %s381_s8 = sshll.u32 %s744_s5, 6  ;;  %s747_s7 = int_to_ptr.vmem [resolvable:$true] %s148_s7 }
  0x1d   : > { %s752_s22 = scalar_lea.hbm %s905_s0, %s381_s8  ;;  %p756_p0 = pnand %p407_p13, %p712_p3 }
  0x1e   : > { %s136_s26 = scalar_lea.sflag [#allocation3], %s736_s29  ;;  %s477_s27 = scalar_lea.hbm %s752_s22, 64 }
  0x1f   : > { %p478_p4 = scmp.ne.s32.totalorder %s752_s22, %s477_s27  ;;  %p479_p5 = pneg %p756_p0 }
  0x20   : > { %s482_s4 = scalar_lea.hbm %s905_s0, 256  ;;  %p483_p3 = scmp.lt.u32.totalorder %s752_s22, %s905_s0 }
  0x21   : > { %p480_p6 = pnand %p479_p5, %p478_p4  ;;  %p484_p10 = scmp.lt.u32.totalorder %s482_s4, %s477_s27 }
  0x22   : > { %p486_p13 = scmp.lt.u32.totalorder %s477_s27, %s752_s22 }
  0x23   : > { %p481_p7 = pneg %p480_p6  ;;  %p485_p11 = por %p484_p10, %p483_p3 }
  0x25   : > { %p487_p1 = por %p486_p13, %p485_p11 }
  0x27   : > { %p488_p2 = pnand %p487_p1, %p481_p7 }
  0x29   : > { %491 = shalt.err (!%p488_p2)
}
  0x2a   : > { %s492_s17 = scalar_lea.vmem %s747_s7, 64  ;;  %s641_s18 = smov [#allocation2]  }
  0x2b   : > { %p493_p4 = scmp.ne.s32.totalorder %s747_s7, %s492_s17  ;;  %s497_s23 = sshll.u32 %s641_s18, 4  ;;  %s498_s23 = int_to_ptr.vmem [resolvable:$false] %s497_s23 }
  0x2c   : > { %s499_s3 = scalar_lea.vmem %s498_s23, 128  ;;  %p500_p9 = scmp.lt.s32.totalorder %s747_s7, %s498_s23 }
  0x2d   : > { %p495_p6 = pnand %p493_p4, %p479_p5  ;;  %p501_p3 = scmp.lt.s32.totalorder %s499_s3, %s492_s17 }
  0x2f   : > { %p496_p12 = pneg %p495_p6  ;;  %p502_p10 = por %p501_p3, %p500_p9 }
  0x31   : > { %p503_p11 = pnand %p502_p10, %p496_p12 }
  0x33   : > { %506 = shalt.err (!%p503_p11)
}
  0x34   : > { %399 = dma.hbm_to_vmem [thread:$0]  (!%p756_p0), %s752_s22, 64, %s747_s7, %s136_s26  }
  0x35   : > { %p915_p1 = scmp.lt.s32.totalorder %s639_s16, 5  ;;  %p916_p2 = scmp.ge.s32.totalorder %s639_s16, 1 }
  0x36   : > { %s383_s4 = sshll.u32 %s744_s5, 4  ;;  %s158_s6 = scalar_lea.vmem [#allocation5], %s736_s29 }
  0x37   : > { %p792_p7 = pnand %p916_p2, %p915_p1  ;;  %s167_s8 = sshll.u32 %s158_s6, 4  ;;  %s168_s8 = int_to_ptr.vmem [resolvable:$true] %s167_s8 }
  0x38   : > { %s801_s23 = scalar_lea.hbm %s906_s1, %s383_s4  ;;  %s156_s7 = scalar_lea.sflag [#allocation6], %s736_s29 }
  0x39   : > { %s917_s27 = scalar_select %p792_p7, 1, 0 }
  0x3a   : > { %s507_s22 = scalar_lea.hbm %s801_s23, 16  ;;  %s512_s3 = scalar_lea.hbm %s906_s1, 64 }
  0x3b   : > { %p508_p9 = scmp.ne.s32.totalorder %s801_s23, %s507_s22  ;;  %p513_p4 = scmp.lt.u32.totalorder %s801_s23, %s906_s1 }
  0x3c   : > { %p514_p6 = scmp.lt.u32.totalorder %s512_s3, %s507_s22  ;;  %p516_p10 = scmp.lt.u32.totalorder %s507_s22, %s801_s23 }
  0x3d   : > { %p510_p12 = pnand %p508_p9, %p479_p5 }
  0x3e   : > { %p515_p3 = por %p514_p6, %p513_p4 }
  0x3f   : > { %p511_p13 = pneg %p510_p12 }
  0x40   : > { %p517_p11 = por %p516_p10, %p515_p3 }
  0x42   : > { %p518_p1 = pnand %p517_p11, %p511_p13 }
  0x44   : > { %521 = shalt.err (!%p518_p1)
}
  0x45   : > { %s522_s29 = scalar_lea.vmem %s168_s8, 16  ;;  %s642_s4 = smov [#allocation5]  }
  0x46   : > { %p523_p2 = scmp.ne.s32.totalorder %s168_s8, %s522_s29  ;;  %s527_s18 = sshll.u32 %s642_s4, 4  ;;  %s528_s18 = int_to_ptr.vmem [resolvable:$false] %s527_s18 }
  0x47   : > { %s529_s5 = scalar_lea.vmem %s528_s18, 32  ;;  %p530_p8 = scmp.lt.s32.totalorder %s168_s8, %s528_s18 }
  0x48   : > { %p525_p9 = pnand %p523_p2, %p479_p5  ;;  %p531_p7 = scmp.lt.s32.totalorder %s529_s5, %s522_s29 }
  0x4a   : > { %p526_p12 = pneg %p525_p9  ;;  %p532_p4 = por %p531_p7, %p530_p8 }
  0x4c   : > { %p533_p6 = pnand %p532_p4, %p526_p12 }
  0x4e   : > { %536 = shalt.err (!%p533_p6)
}
  0x4f   : > { %402 = dma.hbm_to_vmem [thread:$0]  (!%p756_p0), %s801_s23, 16, %s168_s8, %s156_s7  }
  0x50   : > { %p918_p13 = scmp.ne.s32.totalorder %s917_s27, 0 }
  0x51   : > { %s826_s22 = sand.u32 (!%p918_p13), 1, %s615_s10   ;;  %p919_p5 = scmp.ne.s32.totalorder (!%p918_p13), %s911_s24, 0 }
  0x52   : > { %176 = sbr.rel (%p918_p13) target bundleno = 166 (0xa6), region = 28  ;;  %s385_s26 = sshll.u32 (!%p918_p13), %s826_s22, 2 }
  0x53   : > { %s179_s3 = scalar_lea.sflag (!%p918_p13), [#allocation3], %s826_s22  ;;  %s182_s6 = scalar_lea.vmem (!%p918_p13), [#allocation2], %s385_s26 }
  0x59   : > { %598 = dma.done.wait (%p919_p5), %s179_s3, 64  }
  0x5a   : > { %600 = vsyncadd (%p919_p5), %s179_s3, 4294967232  ;;  %s188_s21 = scalar_lea.sflag [#allocation6], %s826_s22  ;;  %s190_s27 = scalar_lea.vmem [#allocation5], %s826_s22 }
  0x5b   : > { %602 = dma.done.wait (%p919_p5), %s188_s21, 16  }
  0x5c   : > { %604 = vsyncadd (%p919_p5), %s188_s21, 4294967280  ;;  %vm216_vm0 = vcmask 1043456   ;;  %v214_v0 = vld [vmem:[%s182_s6] sm:$0xf]  ;;  %v239_v6 = vlaneseq  ;;  %s386_s24 = sshll.u32 %s627_s13, 1  ;;  %s213_s23 = scalar_lea.vmem [#allocation7], %s826_s22 }
  0x5d   : > { %v217_v1 = vsel %vm216_vm0, %v214_v0, -inf  ;;  %v215_v8 = vld [vmem:[%s190_s27] sm:$0x1]  ;;  %s268_s8 = sadd.s32 %s623_s12, %s386_s24  ;;  %s272_s7 = sshll.u32 %s213_s23, 4  ;;  %s847_s7 = int_to_ptr.vmem [resolvable:$true] %s272_s7 }
  0x5e   : > { %v218_v2 = vrot.slane %v217_v1, 4  ;;  %v240_v10 = vshrl.u32 %v239_v6, 7  ;;  %vm237_vm1 = vcmp.ne.s32.totalorder %v215_v8, 255  ;;  %s387_s17 = sshll.u32 %s268_s8, 4  ;;  %s258_s12 = scalar_lea.sflag [#allocation4], %s826_s22 }
  0x5f   : > { %v238_v14 = vsel %vm237_vm1, %v215_v8, 0  ;;  %s852_s18 = scalar_lea.hbm %s907_s2, %s387_s17  ;;  %s537_s13 = scalar_lea.vmem %s847_s7, 16 }
  0x60   : > { %v219_v3 = vmax.f32 %v217_v1, %v218_v2  ;;  %v243_v13 = vsub.s32 0, %v240_v10  ;;  %p538_p8 = scmp.ne.s32.totalorder %s847_s7, %s537_s13  ;;  %p920_p0 = scmp.ne.s32.totalorder %s912_s25, 0 }
  0x61   : > { %s643_s5 = smov [#allocation7]  }
  0x62   : > { %v220_v4 = vrot.slane %v219_v3, 2  ;;  %v244_v15 = vrot.slane %v238_v14, %v243_v13  ;;  %p539_p7 = pnand %p538_p8, %p920_p0  ;;  %s541_s26 = sshll.u32 %s643_s5, 4  ;;  %s542_s26 = int_to_ptr.vmem [resolvable:$false] %s541_s26 }
  0x63   : > { %s543_s3 = scalar_lea.vmem %s542_s26, 32  ;;  %p544_p10 = scmp.lt.s32.totalorder %s847_s7, %s542_s26 }
  0x64   : > { %v221_v5 = vmax.f32 %v219_v3, %v220_v4  ;;  %vm245_vm2 = vcmp.eq.s32.totalorder %v240_v10, %v244_v15  ;;  %p540_p3 = pneg %p539_p7  ;;  %p545_p11 = scmp.lt.s32.totalorder %s543_s3, %s537_s13 }
  0x65   : > { %v246_v16 = vsel %vm245_vm2, %v214_v0, 0.0 }
  0x66   : > { %v222_v7 = vrot.slane %v221_v5, 1  ;;  %v247_v20 = vsel %vm216_vm0, %v246_v16, 0.0  ;;  %p546_p1 = por %p545_p11, %p544_p10 }
  0x67   : > { %v248_v22 = vrot.slane %v247_v20, 4 }
  0x68   : > { %v223_v9 = vmax.f32 %v221_v5, %v222_v7  ;;  %p547_p2 = pnand %p546_p1, %p540_p3 }
  0x69   : > { %v249_v25 = vadd.f32 %v248_v22, %v247_v20 }
  0x6a   : > { %v224_v11 = vsub.f32 %v214_v0, %v223_v9 }
  0x6b   : > { %v250_v28 = vrot.slane %v249_v25, 2 }
  0x6c   : > { %v225_v12 = vmul.f32 1.442695, %v224_v11 }
  0x6d   : > { %v251_v29 = vadd.f32 %v250_v28, %v249_v25 }
  0x6e   : > { %473 = vpow2.f32 %v225_v12 }
  0x6f   : > { %v252_v30 = vrot.slane %v251_v29, 1 }
  0x71   : > { %v253_v33 = vadd.f32 %v252_v30, %v251_v29 }
  0x78   : > { %v474_v17 = vpop.eup %473 }
  0x79   : > { %v227_v18 = vsel %vm216_vm0, %v474_v17, 0.0 }
  0x7a   : > { %v228_v19 = vrot.slane %v227_v18, 4 }
  0x7c   : > { %v229_v21 = vadd.f32 %v228_v19, %v227_v18 }
  0x7e   : > { %v230_v23 = vrot.slane %v229_v21, 2 }
  0x80   : > { %v231_v24 = vadd.f32 %v230_v23, %v229_v21 }
  0x82   : > { %v232_v26 = vrot.slane %v231_v24, 1 }
  0x84   : > { %v233_v27 = vadd.f32 %v232_v26, %v231_v24 }
  0x86   : > { %475 = vlog2.f32 %v233_v27 }
  0x90   : > { %v476_v31 = vpop.eup %475 }
  0x91   : > { %v235_v32 = vmul.f32 0.6931472, %v476_v31 }
  0x93   : > { %v236_v34 = vadd.f32 %v235_v32, %v223_v9 }
  0x95   : > { %v254_v35 = vsub.f32 %v236_v34, %v253_v33 }
  0x97   : > { %v255_v36 = vsel %vm237_vm1, %v254_v35, 0.0 }
  0x98   : > { %256 = vst [vmem:[%s213_s23] sm:$0x1] %v255_v36 }
  0x99   : > { %550 = shalt.err (!%p547_p2)
}
  0x9a   : > { %s551_s22 = scalar_lea.hbm %s852_s18, 16  ;;  %s555_s27 = scalar_lea.hbm %s907_s2, 64 }
  0x9b   : > { %p552_p9 = scmp.ne.s32.totalorder %s852_s18, %s551_s22  ;;  %p556_p6 = scmp.lt.u32.totalorder %s852_s18, %s907_s2 }
  0x9c   : > { %p557_p13 = scmp.lt.u32.totalorder %s555_s27, %s551_s22  ;;  %p559_p8 = scmp.lt.u32.totalorder %s551_s22, %s852_s18 }
  0x9d   : > { %p553_p12 = pnand %p552_p9, %p920_p0 }
  0x9e   : > { %p558_p5 = por %p557_p13, %p556_p6 }
  0x9f   : > { %p554_p4 = pneg %p553_p12 }
  0xa0   : > { %p560_p7 = por %p559_p8, %p558_p5 }
  0xa2   : > { %p561_p3 = pnand %p560_p7, %p554_p4 }
  0xa4   : > { %564 = shalt.err (!%p561_p3)
}
  0xa5   : > { %394 = dma.vmem_to_hbm [thread:$0]  (%p920_p0), %s847_s7, 16, %s852_s18, %s258_s12  }
  0xa6 PF: > { %p408_p10 = scmp.ge.s32.totalorder %s639_s16, 2  ;;  %s284_s23 = sand.u32 1, %s611_s9  }
  0xa7   : > { %p921_p11 = scmp.ne.s32.totalorder %s913_s28, 0  ;;  %s285_s17 = scalar_lea.sflag [#allocation4], %s284_s23 }
  0xa9   : > { %p404_p1 = pnand %p408_p10, %p921_p11 }
  0xab   : > { %606 = dma.done.wait (!%p404_p1), %s285_s17, 16  }
  0xac   : > { %608 = vsyncadd (!%p404_p1), %s285_s17, 4294967280  ;;  %s21_s16 = sadd.s32 1, %s639_s16   ;;  %s922_s9 = smov %s615_s10 }
  0xad   : > { %p18_p2 = scmp.ge.s32.totalorder %s21_s16, 6   ;;  %s923_s10 = smov %s619_s11 }
  0xae   : > { %s924_s11 = smov %s739_s30  ;;  %s925_s12 = smov %s631_s14 }
  0xaf   : > { %s926_s13 = smov %s635_s15  ;;  %s927_s14 = smov %s930_s19 }
  0xb0   : > { %s928_s15 = smov %s934_s20  ;;  %20 = sbr.rel (!%p18_p2) target bundleno = 9 (0x9), region = 86 }
  0xb7   :  { %289 = vsyncpa [#allocation3], 1 }
  0xb8   :  { %291 = vsyncpa [#allocation3 + $0x1], 1 }
  0xb9   :  { %292 = vsyncpa [#allocation6], 1 }
  0xba   :  { %294 = vsyncpa [#allocation6 + $0x1], 1 }
  0xbb   :  { %295 = vsyncpa [#allocation4], 1 }
  0xbc   :  { %297 = vsyncpa [#allocation4 + $0x1], 1 }

</bundles_post_ra>
